<compile_context>
chip_gen: v5e
topology: v5e:2x2
jax: 0.10.0
libtpu: 0.0.40
codegen_flags: <defaults>
</compile_context>

<pallas_src>
import functools

import jax
import jax.numpy as jnp
from jax.experimental import pallas as pl
from jax.experimental.pallas import tpu as pltpu

_LANE = 128
_SUBLANE = 8
_NEG_BIG = -1e30   # padded-class bias: never wins max, exp() underflows to 0
_MAX_TM = 512      # row-tile cap (keeps double-buffered x tile ~3 MB of VMEM)


def _round_up(x, m):
    return ((x + m - 1) // m) * m


def _dnn_kernel(x_ref, w1_ref, b1_ref, w2_ref, b2_ref, o_ref):
    # x_ref:  (TM, D)  f32   w1_ref: (D, Hp)  bf16   b1_ref: (1, Hp) f32
    # w2_ref: (Hp, Kp) bf16  b2_ref: (1, Kp)  f32    o_ref:  (TM, Kp) f32

    # In-kernel cast (hides under the x DMA); fc1 is a canonical contraction.
    x = x_ref[...].astype(jnp.bfloat16)
    h = jnp.dot(x, w1_ref[...], preferred_element_type=jnp.float32)
    h = jnp.maximum(h + b1_ref[...], 0.0)            # bias + ReLU in f32

    # fc2: canonical contraction on Hp; operands bf16, accumulate f32.
    logits = jnp.dot(h.astype(jnp.bfloat16), w2_ref[...],
                     preferred_element_type=jnp.float32)
    logits = logits + b2_ref[...]                    # padded lanes -> ~-1e30

    # Numerically stable log_softmax along the class axis, all in f32.
    m = jnp.max(logits, axis=-1, keepdims=True)
    shifted = logits - m
    lse = jnp.log(jnp.sum(jnp.exp(shifted), axis=-1, keepdims=True))
    o_ref[...] = shifted - lse


def prepare_params(w1, b1, w2, b2):
    """Pad hidden/class dims to lane multiples, transpose weights to the
    canonical (in, out) layout, and cast matmul operands to bf16.
    Run once outside the per-call hot path."""
    mid, d = w1.shape
    k = w2.shape[0]
    hp = _round_up(mid, _LANE)
    kp = _round_up(k, _LANE)

    w1t = jnp.zeros((d, hp), jnp.float32).at[:, :mid].set(
        w1.T.astype(jnp.float32))
    b1_p = jnp.zeros((1, hp), jnp.float32).at[0, :mid].set(
        b1.astype(jnp.float32))
    w2t = jnp.zeros((hp, kp), jnp.float32).at[:mid, :k].set(
        w2.T.astype(jnp.float32))
    b2_p = jnp.full((1, kp), _NEG_BIG, jnp.float32).at[0, :k].set(
        b2.astype(jnp.float32))

    return (w1t.astype(jnp.bfloat16), b1_p,
            w2t.astype(jnp.bfloat16), b2_p, k)


@functools.partial(jax.jit, static_argnames=("num_classes",))
def dnn_forward(x, w1t_p, b1_p, w2t_p, b2_p, num_classes):
    """x: (N, ...) any trailing shape (f32); params from prepare_params."""
    n = x.shape[0]
    x2d = x.reshape(n, -1)                 # torch.flatten(x, 1); stays f32
    d = x2d.shape[1]
    hp = w1t_p.shape[1]
    kp = w2t_p.shape[1]

    # Row-tile policy:
    #  * tiles capped at _MAX_TM rows and balanced so the trailing block is
    #    never nearly empty (no wasted x DMA / compute),
    #  * at least 2 grid steps whenever the batch allows it so the "parallel"
    #    batch axis feeds both TensorCores on v7x (negligible extra step cost
    #    on single-TC v5e/v6e).
    n_pad = _round_up(n, _SUBLANE)
    min_steps = 2 if n_pad >= 2 * _SUBLANE else 1
    steps = max(min_steps, pl.cdiv(n_pad, _MAX_TM))
    tm = _round_up(pl.cdiv(n_pad, steps), _SUBLANE)
    grid = (pl.cdiv(n, tm),)

    cost = pl.CostEstimate(
        flops=2 * n * d * hp + 2 * n * hp * kp,
        transcendentals=n * kp + n,
        bytes_accessed=(n * d * 4 + d * hp * 2 + hp * kp * 2
                        + (hp + kp) * 4 + n * kp * 4),
    )

    out_p = pl.pallas_call(
        _dnn_kernel,
        out_shape=jax.ShapeDtypeStruct((n, kp), jnp.float32),
        grid=grid,
        in_specs=[
            pl.BlockSpec((tm, d), lambda i: (i, 0)),     # x: tiled rows, f32
            pl.BlockSpec((d, hp), lambda i: (0, 0)),     # W1^T: resident
            pl.BlockSpec((1, hp), lambda i: (0, 0)),     # b1: resident
            pl.BlockSpec((hp, kp), lambda i: (0, 0)),    # W2^T: resident
            pl.BlockSpec((1, kp), lambda i: (0, 0)),     # b2: resident
        ],
        out_specs=pl.BlockSpec((tm, kp), lambda i: (i, 0)),
        compiler_params=pltpu.CompilerParams(
            dimension_semantics=("parallel",),           # megacore on v7x
        ),
        cost_estimate=cost,
    )(x2d, w1t_p, b1_p, w2t_p, b2_p)

    return out_p[:, :num_classes]


if __name__ == "__main__":
    input_dim = 784   # 1 x 28 x 28 (module default)
    mid_dim = 100
    output_dim = 10
    batch = 2

    key = jax.random.PRNGKey(0)
    kx, k1, k2, k3, k4 = jax.random.split(key, 5)

    # nn.Linear-style init: U(-1/sqrt(fan_in), 1/sqrt(fan_in))
    bound1 = 1.0 / (input_dim ** 0.5)
    w1 = jax.random.uniform(k1, (mid_dim, input_dim),
                            minval=-bound1, maxval=bound1, dtype=jnp.float32)
    b1 = jax.random.uniform(k2, (mid_dim,),
                            minval=-bound1, maxval=bound1, dtype=jnp.float32)
    bound2 = 1.0 / (mid_dim ** 0.5)
    w2 = jax.random.uniform(k3, (output_dim, mid_dim),
                            minval=-bound2, maxval=bound2, dtype=jnp.float32)
    b2 = jax.random.uniform(k4, (output_dim,),
                            minval=-bound2, maxval=bound2, dtype=jnp.float32)

    # NCHW input, flattened inside the wrapper (matches torch.flatten(x, 1))
    x = jax.random.normal(kx, (batch, 1, 28, 28), dtype=jnp.float32)

    w1t_p, b1_p, w2t_p, b2_p, k = prepare_params(w1, b1, w2, b2)
    out = dnn_forward(x, w1t_p, b1_p, w2t_p, b2_p, num_classes=k)
    jax.block_until_ready(out)

    # sanity 1: log_softmax rows exponentiate-sum to ~1
    row_sums = jnp.sum(jnp.exp(out), axis=1)
    assert out.shape == (batch, output_dim)
    assert bool(jnp.all(jnp.abs(row_sums - 1.0) < 1e-3))

    # sanity 2: matches a pure-JAX f32 reference (bf16 matmul tolerance)
    x2d = x.reshape(batch, -1)
    ref = jax.nn.log_softmax(
        jnp.maximum(x2d @ w1.T + b1, 0.0) @ w2.T + b2, axis=1)
    assert bool(jnp.all(jnp.abs(out - ref) < 5e-2))

    print("KERNEL_OK")
</pallas_src>

<mosaic_0001>
module attributes {stable_mosaic.version = 11 : i64} {
  func.func @_dnn_kernel(%arg0: i32, %arg1: memref<8x784xf32, #tpu.memory_space<vmem>>, %arg2: memref<784x128xbf16, #tpu.memory_space<vmem>>, %arg3: memref<1x128xf32, #tpu.memory_space<vmem>>, %arg4: memref<128x128xbf16, #tpu.memory_space<vmem>>, %arg5: memref<1x128xf32, #tpu.memory_space<vmem>>, %arg6: memref<8x128xf32, #tpu.memory_space<vmem>>) attributes {dimension_semantics = [#tpu.dimension_semantics<parallel>], iteration_bounds = array<i64: 1>, scalar_prefetch = 0 : i64, scratch_operands = 0 : i64, tpu.core_type = #tpu.core_type<tc>, window_params = [{transform_indices = @transform_0, window_bounds = array<i64: 8, 784>}, {pipeline_mode = #tpu.pipeline_mode<synchronous>, transform_indices = @transform_1, window_bounds = array<i64: 784, 128>}, {pipeline_mode = #tpu.pipeline_mode<synchronous>, transform_indices = @transform_2, window_bounds = array<i64: 1, 128>}, {pipeline_mode = #tpu.pipeline_mode<synchronous>, transform_indices = @transform_3, window_bounds = array<i64: 128, 128>}, {pipeline_mode = #tpu.pipeline_mode<synchronous>, transform_indices = @transform_4, window_bounds = array<i64: 1, 128>}, {transform_indices = @transform_5, window_bounds = array<i64: 8, 128>}]} {
    %c0 = arith.constant 0 : index
    %c0_0 = arith.constant 0 : index
    %0 = vector.load %arg1[%c0, %c0_0] : memref<8x784xf32, #tpu.memory_space<vmem>>, vector<8x784xf32>
    %1 = arith.truncf %0 : vector<8x784xf32> to vector<8x784xbf16>
    %c0_1 = arith.constant 0 : index
    %c0_2 = arith.constant 0 : index
    %2 = vector.load %arg2[%c0_1, %c0_2] : memref<784x128xbf16, #tpu.memory_space<vmem>>, vector<784x128xbf16>
    %cst = arith.constant dense<0.000000e+00> : vector<8x128xf32>
    %3 = tpu.matmul %1, %2, %cst {dimension_numbers = #tpu.dot_dimension_numbers<[1], [0], [0], [1], [0, 0, 1, 1], [], []>} : vector<8x784xbf16>, vector<784x128xbf16>, vector<8x128xf32> -> vector<8x128xf32>
    %c0_3 = arith.constant 0 : index
    %c0_4 = arith.constant 0 : index
    %4 = vector.load %arg3[%c0_3, %c0_4] : memref<1x128xf32, #tpu.memory_space<vmem>>, vector<1x128xf32>
    %5 = vector.broadcast %4 : vector<1x128xf32> to vector<8x128xf32>
    %6 = arith.addf %3, %5 : vector<8x128xf32>
    %cst_5 = arith.constant 0.000000e+00 : f32
    %7 = vector.broadcast %cst_5 : f32 to vector<8x128xf32>
    %8 = arith.maximumf %6, %7 : vector<8x128xf32>
    %9 = arith.truncf %8 : vector<8x128xf32> to vector<8x128xbf16>
    %c0_6 = arith.constant 0 : index
    %c0_7 = arith.constant 0 : index
    %10 = vector.load %arg4[%c0_6, %c0_7] : memref<128x128xbf16, #tpu.memory_space<vmem>>, vector<128x128xbf16>
    %cst_8 = arith.constant dense<0.000000e+00> : vector<8x128xf32>
    %11 = tpu.matmul %9, %10, %cst_8 {dimension_numbers = #tpu.dot_dimension_numbers<[1], [0], [0], [1], [0, 0, 1, 1], [], []>} : vector<8x128xbf16>, vector<128x128xbf16>, vector<8x128xf32> -> vector<8x128xf32>
    %c0_9 = arith.constant 0 : index
    %c0_10 = arith.constant 0 : index
    %12 = vector.load %arg5[%c0_9, %c0_10] : memref<1x128xf32, #tpu.memory_space<vmem>>, vector<1x128xf32>
    %13 = vector.broadcast %12 : vector<1x128xf32> to vector<8x128xf32>
    %14 = arith.addf %11, %13 : vector<8x128xf32>
    %cst_11 = arith.constant dense<0xFF800000> : vector<8xf32>
    %15 = vector.multi_reduction <maximumf>, %14, %cst_11 [1] : vector<8x128xf32> to vector<8xf32>
    %16 = vector.shape_cast %15 : vector<8xf32> to vector<8x1xf32>
    %17 = vector.broadcast %16 : vector<8x1xf32> to vector<8x128xf32>
    %18 = arith.subf %14, %17 : vector<8x128xf32>
    %19 = math.exp %18 : vector<8x128xf32>
    %cst_12 = arith.constant dense<0.000000e+00> : vector<8xf32>
    %20 = vector.multi_reduction <add>, %19, %cst_12 [1] : vector<8x128xf32> to vector<8xf32>
    %21 = vector.shape_cast %20 : vector<8xf32> to vector<8x1xf32>
    %22 = math.log %21 : vector<8x1xf32>
    %23 = vector.broadcast %22 : vector<8x1xf32> to vector<8x128xf32>
    %24 = arith.subf %18, %23 : vector<8x128xf32>
    %c0_13 = arith.constant 0 : index
    %c0_14 = arith.constant 0 : index
    %25 = vector.load %arg6[%c0_13, %c0_14] : memref<8x128xf32, #tpu.memory_space<vmem>>, vector<8x128xf32>
    tpu.vector_store %arg6[%c0_13, %c0_14], %24 {strides = array<i32>} : memref<8x128xf32, #tpu.memory_space<vmem>>, vector<8x128xf32>,
    return
  }
  func.func @transform_0(%arg0: i32) -> (i32, i32) {
    %c0_i32 = arith.constant 0 : i32
    %c0_i32_0 = arith.constant 0 : i32
    return %arg0, %c0_i32 : i32, i32
  }
  func.func @transform_1(%arg0: i32) -> (i32, i32) {
    %c0_i32 = arith.constant 0 : i32
    %c0_i32_0 = arith.constant 0 : i32
    %c0_i32_1 = arith.constant 0 : i32
    return %c0_i32, %c0_i32_0 : i32, i32
  }
  func.func @transform_2(%arg0: i32) -> (i32, i32) {
    %c0_i32 = arith.constant 0 : i32
    %c0_i32_0 = arith.constant 0 : i32
    %c0_i32_1 = arith.constant 0 : i32
    return %c0_i32, %c0_i32_0 : i32, i32
  }
  func.func @transform_3(%arg0: i32) -> (i32, i32) {
    %c0_i32 = arith.constant 0 : i32
    %c0_i32_0 = arith.constant 0 : i32
    %c0_i32_1 = arith.constant 0 : i32
    return %c0_i32, %c0_i32_0 : i32, i32
  }
  func.func @transform_4(%arg0: i32) -> (i32, i32) {
    %c0_i32 = arith.constant 0 : i32
    %c0_i32_0 = arith.constant 0 : i32
    %c0_i32_1 = arith.constant 0 : i32
    return %c0_i32, %c0_i32_0 : i32, i32
  }
  func.func @transform_5(%arg0: i32) -> (i32, i32) {
    %c0_i32 = arith.constant 0 : i32
    %c0_i32_0 = arith.constant 0 : i32
    return %arg0, %c0_i32 : i32, i32
  }
}

</mosaic_0001>

<bundles_post_ra>
// kernel: dnn_forward.1
= control target key start
LH: loop header
LB: loop body
LE: loop exit
PB: predicated region body
PF: predicated region fallthrough
CT: control target
= control target key end

     0   :  { %10 = vsyncpa [#allocation3], 0  ;;  %s1140_s0 = inlined_call_operand.vmem [shape: f32[2,784], index: 0, kind: input, shape index: {}]   ;;  %s1141_s1 = inlined_call_operand.hbm [shape: bf16[784,128], index: 1, kind: input, shape index: {}]   ;;  %s1142_s2 = inlined_call_operand.vmem [shape: f32[1,128], index: 2, kind: input, shape index: {}]   ;;  %s1143_s3 = inlined_call_operand.vmem [shape: bf16[128,128], index: 3, kind: input, shape index: {}]   ;;  %s1144_s4 = inlined_call_operand.vmem [shape: f32[1,128], index: 4, kind: input, shape index: {}]   ;;  %s1145_s5 = inlined_call_operand.hbm [shape: f32[2,128], index: 5, kind: output, shape index: {}]  }
   0x1   :  { %11 = vsyncpa [#allocation4], 0  ;;  %s18_s20 = sshll.u32 %s1141_s1, 4  ;;  %s1044_s21 = smov [#allocation2]   ;;  %s19_s20 = int_to_ptr.hbm [resolvable:$true] %s18_s20 }
   0x2   :  { %s20_s22 = sshll.u32 %s1044_s21, 4  ;;  %s1045_s23 = smov 64   ;;  %s21_s22 = int_to_ptr.vmem [resolvable:$true] %s20_s22 }
   0x3   :  { %s1046_s24 = smov 4  }
   0x4   :  { %26 = dma.hbm_to_vmem [thread:$0]  %s19_s20, 6272, %s21_s22, [#allocation3], %s1045_s23, %s1045_s23, %s1046_s24  }
   0x5   :  { %1040 = dma.done.wait [#allocation3], 6272  }
   0x6   :  { %1041 = vsyncadd [#allocation3], 4294961024  ;;  %v930_v0 = vld [vmem:[#allocation2 + $0x38] sm:$0xff]  ;;  %v929_v3 = vld [vmem:[#allocation2 + $0x30] sm:$0xff]  ;;  %vm486_vm0 = vcmask 130048  }
   0x7   :  { %v938_v1 = vld [vmem:[#allocation2 + $0x78] sm:$0xff]  ;;  %490 = vmatpush.bf16.msra.mxu0 %v930_v0  ;;  %v937_v4 = vld [vmem:[#allocation2 + $0x70] sm:$0xff]  ;;  %v928_v8 = vld [vmem:[#allocation2 + $0x28] sm:$0xff] }
   0x8   :  { %v946_v2 = vld [vmem:[#allocation2 + $0xb8] sm:$0xff]  ;;  %503 = vmatpush.bf16.msra.mxu1 %v938_v1  ;;  %v945_v5 = vld [vmem:[#allocation2 + $0xb0] sm:$0xff]  ;;  %v936_v9 = vld [vmem:[#allocation2 + $0x68] sm:$0xff] }
   0x9   :  { %516 = vmatpush.bf16.msra.mxu2 %v946_v2  ;;  %v954_v6 = vld [vmem:[#allocation2 + $0xf8] sm:$0xff]  ;;  %v953_v7 = vld [vmem:[#allocation2 + $0xf0] sm:$0xff]  ;;  %v944_v10 = vld [vmem:[#allocation2 + $0xa8] sm:$0xff] }
   0xa   :  { %529 = vmatpush.bf16.msra.mxu3 %v954_v6  ;;  %v952_v11 = vld [vmem:[#allocation2 + $0xe8] sm:$0xff]  ;;  %v927_v12 = vld [vmem:[#allocation2 + $0x20] sm:$0xff]  ;;  %v38_v15 = vld [vmem:[%s1140_s0] sm:$0xff] }
   0xb   :  { %491 = vmatpush.bf16.msra.mxu0 %v929_v3  ;;  %v935_v13 = vld [vmem:[#allocation2 + $0x60] sm:$0xff]  ;;  %v42_v17 = vld [vmem:[%s1140_s0 + $0x1c] sm:$0xff]  ;;  %54 = vst [vmem:[#allocation1] ss:$4 sm:$0xff] %v38_v15  ;;  %v41_v25 = vld [vmem:[%s1140_s0 + $0x16] sm:$0x3f] }
   0xc   :  { %504 = vmatpush.bf16.msra.mxu1 %v937_v4  ;;  %v943_v14 = vld [vmem:[#allocation2 + $0xa0] sm:$0xff]  ;;  %v926_v20 = vld [vmem:[#allocation2 + $0x18] sm:$0xff]  ;;  %58 = vst [vmem:[#allocation1 + $0x2] ss:$4 sm:$0xff] %v42_v17  ;;  %v925_v23 = vld [vmem:[#allocation2 + $0x10] sm:$0xff] }
   0xd   :  { %517 = vmatpush.bf16.msra.mxu2 %v945_v5  ;;  %v40_v16 = vld [vmem:[%s1140_s0 + $0xe] sm:$0xff]  ;;  %v934_v21 = vld [vmem:[#allocation2 + $0x58] sm:$0xff]  ;;  %v39_v24 = vld [vmem:[%s1140_s0 + $0x8] sm:$0x3f]  ;;  %64 = vst [vmem:[#allocation1 + $0x21] ss:$4 sm:$0xff] %v41_v25 }
   0xe   :  { %530 = vmatpush.bf16.msra.mxu3 %v953_v7  ;;  %v44_v18 = vld [vmem:[%s1140_s0 + $0x2a] sm:$0xff]  ;;  %56 = vst [vmem:[#allocation1 + $0x1] ss:$4 sm:$0xff] %v40_v16  ;;  %v942_v22 = vld [vmem:[#allocation2 + $0x98] sm:$0xff]  ;;  %v933_v27 = vld [vmem:[#allocation2 + $0x50] sm:$0xff] }
   0xf   :  { %492 = vmatpush.bf16.msra.mxu0 %v928_v8  ;;  %v951_v19 = vld [vmem:[#allocation2 + $0xe0] sm:$0xff]  ;;  %60 = vst [vmem:[#allocation1 + $0x3] ss:$4 sm:$0xff] %v44_v18  ;;  %v950_v28 = vld [vmem:[#allocation2 + $0xd8] sm:$0xff]  ;;  %v45_v29 = vld [vmem:[%s1140_s0 + $0x32] sm:$0x3f] }
  0x10   :  { %505 = vmatpush.bf16.msra.mxu1 %v936_v9  ;;  %v43_v26 = vld [vmem:[%s1140_s0 + $0x24] sm:$0x3f]  ;;  %62 = vst [vmem:[#allocation1 + $0x20] ss:$4 sm:$0xff] %v39_v24  ;;  %v941_v30 = vld [vmem:[#allocation2 + $0x90] sm:$0xff]  ;;  %v924_v32 = vld [vmem:[#allocation2 + $0x8] sm:$0xff] }
  0x11   :  { %518 = vmatpush.bf16.msra.mxu2 %v944_v10  ;;  %66 = vst [vmem:[#allocation1 + $0x22] ss:$4 sm:$0xff] %v43_v26  ;;  %v949_v31 = vld [vmem:[#allocation2 + $0xd0] sm:$0xff]  ;;  %v932_v33 = vld [vmem:[#allocation2 + $0x48] sm:$0xff]  ;;  %v923_v35 = vld [vmem:[#allocation2] sm:$0xff] }
  0x12   :  { %531 = vmatpush.bf16.msra.mxu3 %v952_v11  ;;  %68 = vst [vmem:[#allocation1 + $0x23] ss:$4 sm:$0xff] %v45_v29  ;;  %v940_v34 = vld [vmem:[#allocation2 + $0x88] sm:$0xff]  ;;  %v931_v36 = vld [vmem:[#allocation2 + $0x40] sm:$0xff]  ;;  %v962_v40 = vld [vmem:[#allocation2 + $0x138] sm:$0xff] }
  0x13   :  { %493 = vmatpush.bf16.msra.mxu0 %v927_v12  ;;  %v948_v37 = vld [vmem:[#allocation2 + $0xc8] sm:$0xff]  ;;  %v970_v41 = vld [vmem:[#allocation2 + $0x178] sm:$0xff]  ;;  %v939_v42 = vld [vmem:[#allocation2 + $0x80] sm:$0xff] }
  0x14   :  { %506 = vmatpush.bf16.msra.mxu1 %v935_v13  ;;  %v947_v46 = vld [vmem:[#allocation2 + $0xc0] sm:$0xff]  ;;  %v961_v49 = vld [vmem:[#allocation2 + $0x130] sm:$0xff]  ;;  %v960_v53 = vld [vmem:[#allocation2 + $0x128] sm:$0xff] }
  0x15   :  { %519 = vmatpush.bf16.msra.mxu2 %v943_v14  ;;  %v971_v47 = vld [vmem:[#allocation2 + $0x180] sm:$0xff]  ;;  %v969_v50 = vld [vmem:[#allocation2 + $0x170] sm:$0xff]  ;;  %v968_v54 = vld [vmem:[#allocation2 + $0x168] sm:$0xff] }
  0x16   :  { %532 = vmatpush.bf16.msra.mxu3 %v951_v19  ;;  %v69_v38 = vld.sshfl [vmem:[#allocation1] sm:$0xff pattern:$0x73625140]  ;;  %v70_v39 = vld.sshfl [vmem:[#allocation1 + $0x8] sm:$0xff pattern:$0x73625140] }
  0x17   :  { %494 = vmatpush.bf16.msra.mxu0 %v926_v20  ;;  %v71_v43 = vld.sshfl [vmem:[#allocation1 + $0x10] sm:$0xff pattern:$0x73625140]  ;;  %v83_v44 = vpack.c.bf16 %v69_v38, %v69_v38  ;;  %v84_v45 = vpack.c.bf16 %v70_v39, %v70_v39  ;;  %v72_v48 = vld.sshfl [vmem:[#allocation1 + $0x18] sm:$0xff pattern:$0x73625140] }
  0x18   :  { %507 = vmatpush.bf16.msra.mxu1 %v934_v21  ;;  %v85_v51 = vpack.c.bf16 %v71_v43, %v71_v43  ;;  %v86_v52 = vpack.c.bf16 %v72_v48, %v72_v48  ;;  %v959_v55 = vld [vmem:[#allocation2 + $0x120] sm:$0xff]  ;;  %v958_v57 = vld [vmem:[#allocation2 + $0x118] sm:$0xff]  ;;  %v957_v60 = vld [vmem:[#allocation2 + $0x110] sm:$0xff] }
  0x19   :  { %520 = vmatpush.bf16.msra.mxu2 %v942_v22  ;;  %v967_v56 = vld [vmem:[#allocation2 + $0x160] sm:$0xff]  ;;  %v966_v58 = vld [vmem:[#allocation2 + $0x158] sm:$0xff]  ;;  %v75_v59 = vld.sshfl [vmem:[#allocation1 + $0x30] sm:$0xff pattern:$0x73625140] }
  0x1a   :  { %533 = vmatpush.bf16.msra.mxu3 %v950_v28  ;;  %v965_v61 = vld [vmem:[#allocation2 + $0x150] sm:$0xff]  ;;  %v89_v62 = vpack.c.bf16 %v75_v59, %v75_v59  ;;  %v956_v63 = vld [vmem:[#allocation2 + $0x108] sm:$0xff]  ;;  %v955_v1 = vld [vmem:[#allocation2 + $0x100] sm:$0xff] }
  0x1b   :  { %495 = vmatpush.bf16.msra.mxu0 %v925_v23  ;;  %v964_v0 = vld [vmem:[#allocation2 + $0x148] sm:$0xff]  ;;  %v963_v2 = vld [vmem:[#allocation2 + $0x140] sm:$0xff]  ;;  %v73_v3 = vld.sshfl [vmem:[#allocation1 + $0x20] sm:$0xff pattern:$0x73625140] }
  0x1c   :  { %508 = vmatpush.bf16.msra.mxu1 %v933_v27  ;;  %v74_v4 = vld.sshfl [vmem:[#allocation1 + $0x28] sm:$0xff pattern:$0x73625140]  ;;  %v87_v5 = vpack.c.bf16 %v73_v3, %v73_v3  ;;  %v979_v7 = vld [vmem:[%s1143_s3 + $0x38] sm:$0xff]  ;;  %v978_v8 = vld [vmem:[%s1143_s3 + $0x30] sm:$0xff] }
  0x1d   :  { %521 = vmatpush.bf16.msra.mxu2 %v941_v30  ;;  %v88_v6 = vpack.c.bf16 %v74_v4, %v74_v4  ;;  %v977_v9 = vld [vmem:[%s1143_s3 + $0x28] sm:$0xff]  ;;  %v976_v10 = vld [vmem:[%s1143_s3 + $0x20] sm:$0xff]  ;;  %v975_v11 = vld [vmem:[%s1143_s3 + $0x18] sm:$0xff] }
  0x1e   :  { %534 = vmatpush.bf16.msra.mxu3 %v949_v31  ;;  %v974_v12 = vld [vmem:[%s1143_s3 + $0x10] sm:$0xff]  ;;  %v973_v13 = vld [vmem:[%s1143_s3 + $0x8] sm:$0xff]  ;;  %v972_v16 = vld [vmem:[%s1143_s3] sm:$0xff] }
  0x1f   :  { %496 = vmatpush.bf16.msra.mxu0 %v924_v32  ;;  %v986_v21 = vld [vmem:[%s1142_s2] ss:$0 sm:$0xff] }
  0x20   :  { %509 = vmatpush.bf16.msra.mxu1 %v932_v33  ;;  %v987_v39 = vld [vmem:[%s1144_s4] ss:$0 sm:$0xff] }
  0x21   :  { %522 = vmatpush.bf16.msra.mxu2 %v940_v34 }
  0x22   :  { %535 = vmatpush.bf16.msra.mxu3 %v948_v37 }
  0x23   :  { %497 = vmatpush.bf16.msra.mxu0 %v923_v35 }
  0x24   :  { %510 = vmatpush.bf16.msra.mxu1 %v931_v36 }
  0x25   :  { %523 = vmatpush.bf16.msra.mxu2 %v939_v42 }
  0x26   :  { %498 = vmatmul.bf16.vlgmr.msra.gmra.mxu0 %v83_v44  ;;  %536 = vmatpush.bf16.msra.mxu3 %v947_v46 }
  0x27   :  { %542 = vmatpush.bf16.msrb.mxu0 %v962_v40  ;;  %511 = vmatmul.bf16.vlgmr.msra.gmra.mxu1 %v84_v45 }
  0x28   :  { %555 = vmatpush.bf16.msrb.mxu1 %v970_v41  ;;  %524 = vmatmul.bf16.vlgmr.msra.gmra.mxu2 %v85_v51 }
  0x29   :  { %575 = vmatpush.bf16.msrb.mxu2 %v971_v47  ;;  %537 = vmatmul.bf16.vlgmr.msra.gmra.mxu3 %v86_v52 }
  0x2a   :  { %651 = vmatpush.bf16.msrb.mxu3 %v979_v7 }
  0x2b   :  { %543 = vmatpush.bf16.msrb.mxu0 %v961_v49 }
  0x2c   :  { %556 = vmatpush.bf16.msrb.mxu1 %v969_v50 }
  0x2e   :  { %652 = vmatpush.bf16.msrb.mxu3 %v978_v8 }
  0x2f   :  { %544 = vmatpush.bf16.msrb.mxu0 %v960_v53 }
  0x30   :  { %557 = vmatpush.bf16.msrb.mxu1 %v968_v54 }
  0x32   :  { %653 = vmatpush.bf16.msrb.mxu3 %v977_v9 }
  0x33   :  { %545 = vmatpush.bf16.msrb.mxu0 %v959_v55 }
  0x34   :  { %558 = vmatpush.bf16.msrb.mxu1 %v967_v56 }
  0x36   :  { %654 = vmatpush.bf16.msrb.mxu3 %v976_v10 }
  0x37   :  { %546 = vmatpush.bf16.msrb.mxu0 %v958_v57 }
  0x38   :  { %559 = vmatpush.bf16.msrb.mxu1 %v966_v58  ;;  %890 = vmatmul.msk.bf16.vlgmr.msrb.gmra.mxu2 %vm486_vm0, %v89_v62 }
  0x3a   :  { %655 = vmatpush.bf16.msrb.mxu3 %v975_v11 }
  0x3b   :  { %547 = vmatpush.bf16.msrb.mxu0 %v957_v60 }
  0x3c   :  { %560 = vmatpush.bf16.msrb.mxu1 %v965_v61 }
  0x3e   :  { %656 = vmatpush.bf16.msrb.mxu3 %v974_v12 }
  0x3f   :  { %548 = vmatpush.bf16.msrb.mxu0 %v956_v63 }
  0x40   :  { %561 = vmatpush.bf16.msrb.mxu1 %v964_v0 }
  0x42   :  { %657 = vmatpush.bf16.msrb.mxu3 %v973_v13 }
  0x43   :  { %549 = vmatpush.bf16.msrb.mxu0 %v955_v1 }
  0x44   :  { %562 = vmatpush.bf16.msrb.mxu1 %v963_v2 }
  0x46   :  { %550 = vmatmul.bf16.vlgmr.msrb.gmra.mxu0 %v87_v5  ;;  %658 = vmatpush.bf16.msrb.mxu3 %v972_v16 }
  0x47   :  { %563 = vmatmul.bf16.vlgmr.msrb.gmra.mxu1 %v88_v6 }
  0xa3   :  { %v499_v14 = vpop.f32.mrf.mxu0 }
  0xa4   :  { %v512_v15 = vpop.f32.mrf.mxu1  ;;  %v500_v22 = vadd.f32 %v986_v21, %v499_v14 }
  0xa6   :  { %v513_v25 = vadd.f32 %v512_v15, %v500_v22 }
  0xab   :  { %v501_v17 = vpop.f32.mrf.mxu0  ;;  %v525_v19 = vpop.f32.mrf.mxu2 }
  0xac   :  { %v514_v18 = vpop.f32.mrf.mxu1  ;;  %v538_v20 = vpop.f32.mrf.mxu3  ;;  %v526_v26 = vadd.f32 %v525_v19, %v513_v25 }
  0xae   :  { %v539_v28 = vadd.f32 %v538_v20, %v526_v26 }
  0xb3   :  { %v527_v23 = vpop.f32.mrf.mxu2 }
  0xb4   :  { %v540_v24 = vpop.f32.mrf.mxu3 }
  0xbb   :  { %v577_v27 = vpop.f32.mrf.mxu2 }
  0xc3   :  { %v551_v29 = vpop.f32.mrf.mxu0  ;;  %v579_v33 = vpop.f32.mrf.mxu2 }
  0xc4   :  { %v564_v30 = vpop.f32.mrf.mxu1  ;;  %v552_v31 = vadd.f32 %v551_v29, %v539_v28 }
  0xc6   :  { %v565_v32 = vadd.f32 %v564_v30, %v552_v31 }
  0xc8   :  { %v578_v34 = vadd.f32 %v577_v27, %v565_v32 }
  0xca   :  { %v581_v35 = vmax.f32 %v578_v34, 0.0 }
  0xcb   :  { %v553_v36 = vpop.f32.mrf.mxu0 }
  0xcc   :  { %v566_v37 = vpop.f32.mrf.mxu1  ;;  %v582_v38 = vpack.c.bf16 %v581_v35, %v581_v35 }
  0xce   :  { %659 = vmatmul.bf16.vlgmr.msrb.gmra.mxu3 %v582_v38 }
 0x151   :  { %v660_v40 = vpop.f32.mrf.mxu3 }
 0x152   :  { %v661_v41 = vadd.f32 %v987_v39, %v660_v40 }
 0x154   :  { %664 = vmax.xlane.f32.xlu0 %v661_v41 }
 0x159   :  { %v662_v42 = vpop.f32.mrf.mxu3 }
 0x1c7   :  { %v665_v43 = vpop.xlane.xlu0 %664 }
 0x1c8   :  { %v666_v44 = vsub.f32 %v661_v41, %v665_v43 }
 0x1ca   :  { %v667_v45 = vmul.f32 1.442695, %v666_v44 }
 0x1cc   :  { %988 = vpow2.f32 %v667_v45 }
 0x1d2   :  { %v989_v46 = vpop.eup %988 }
 0x1d3   :  { %669 = vadd.xlane.f32.xlu0 %v989_v46 }
 0x246   :  { %v670_v47 = vpop.xlane.xlu0 %669 }
 0x247   :  { %990 = vlog2.f32 %v670_v47 }
 0x24d   :  { %v991_v48 = vpop.eup %990 }
 0x24e   :  { %v672_v49 = vmul.f32 0.6931472, %v991_v48 }
 0x250   :  { %v673_v50 = vsub.f32 %v666_v44, %v672_v49 }
 0x252   :  { %674 = vst [vmem:[#allocation5] sm:$0xff] %v673_v50 }
 0x253   :  { %678 = vsyncadd [#allocation4], 96  ;;  %s681_s4 = sshll.u32 %s1145_s5, 4  ;;  %s1047_s8 = smov [#allocation5]   ;;  %s682_s4 = int_to_ptr.hbm [resolvable:$true] %s681_s4 }
 0x254   :  { %s679_s9 = sshll.u32 %s1047_s8, 4  ;;  %s1048_s10 = smov 32   ;;  %s680_s9 = int_to_ptr.vmem [resolvable:$true] %s679_s9 }
 0x255   :  { %s1049_s11 = smov 2  }
 0x256   :  { %687 = dma.vmem_to_hbm [thread:$0]  %s680_s9, 32, %s682_s4, [#allocation4], %s1048_s10, %s1048_s10, %s1049_s11  }
 0x257   :  { %1042 = dma.done.wait [#allocation4], 128  }
 0x258   :  { %1043 = vsyncadd [#allocation4], 4294967168 }
 0x259   :  { %692 = vsyncpa [#allocation3], 1 }
 0x25a   :  { %693 = vsyncpa [#allocation4], 1 }

</bundles_post_ra>
